<compile_context>
chip_gen: v6e
topology: v6e:2x2x1
jax: 0.10.0
libtpu: 0.0.40
codegen_flags: <defaults>
</compile_context>

<pallas_src>
import functools

import jax
import jax.numpy as jnp
import numpy as np
from jax import lax
from jax.experimental import pallas as pl
from jax.experimental.pallas import tpu as pltpu


def _relative_loss_partials_kernel(pred_ref, label_ref, out_ref, *, B, TB, N):
    pid = pl.program_id(0)

    pred = pred_ref[...].astype(jnp.float32)
    label = label_ref[...].astype(jnp.float32)
    e = pred - label  # error, computed once for all numerators + integral term

    # Row (batch) validity mask for the (possibly padded) last tile.
    row_ids = pid * TB + lax.broadcasted_iota(jnp.int32, (TB, 1), 0)
    row_valid = row_ids < B  # (TB, 1) bool

    # Lane masks for first / second differences (torch.diff widths N-1, N-2).
    lane_ids = lax.broadcasted_iota(jnp.int32, (TB, N), 1)
    d1_mask = lane_ids < (N - 1)
    d2_mask = lane_ids < (N - 2)

    def shift_left(x):
        # out[:, i] == x[:, i + 1] for i < N-1 (lane N-1 is circular garbage,
        # always masked before use).  XLU rotate slot — no misaligned slices.
        return pltpu.roll(x, shift=N - 1, axis=1)

    de = shift_left(e) - e           # first diff of error  (valid lanes < N-1)
    d2e = shift_left(de) - de        # second diff of error (valid lanes < N-2)
    dl = shift_left(label) - label   # first diff of label
    d2l = shift_left(dl) - dl        # second diff of label

    def rel_partial(err, lab, lane_mask):
        # sum over valid rows of:  sum(err^2, dim=1) / (max(lab) - min(lab))^2
        if lane_mask is None:
            sq = jnp.sum(err * err, axis=1, keepdims=True)
            lmax = jnp.max(lab, axis=1, keepdims=True)
            lmin = jnp.min(lab, axis=1, keepdims=True)
        else:
            sq = jnp.sum(jnp.where(lane_mask, err * err, 0.0),
                         axis=1, keepdims=True)
            lmax = jnp.max(jnp.where(lane_mask, lab, -jnp.inf),
                           axis=1, keepdims=True)
            lmin = jnp.min(jnp.where(lane_mask, lab, jnp.inf),
                           axis=1, keepdims=True)
        curve_range = (lmax - lmin) ** 2            # (TB, 1)
        ratio = sq / curve_range                    # (TB, 1)
        return jnp.sum(jnp.where(row_valid, ratio, 0.0))  # scalar

    e_sum = jnp.sum(jnp.where(row_valid, e, 0.0))   # integral partial sum
    pos_sum = rel_partial(e, label, None)
    sharp_sum = rel_partial(de, dl, d1_mask)
    smooth_sum = rel_partial(d2e, d2l, d2_mask)

    # Pack the four partial scalars into lanes 0..3 of this grid step's own
    # (8, 128) output block with a single dense store (lanes >= 4 are zero).
    out_lane = lax.broadcasted_iota(jnp.int32, (8, 128), 1)
    out_ref[...] = (jnp.where(out_lane == 0, e_sum, 0.0)
                    + jnp.where(out_lane == 1, pos_sum, 0.0)
                    + jnp.where(out_lane == 2, sharp_sum, 0.0)
                    + jnp.where(out_lane == 3, smooth_sum, 0.0))


def relative_loss(pred, label, *, integ_ratio=1.0, pos_ratio=1.0,
                  sharp_ratio=1.0, smooth_ratio=1.0, block_rows=512):
    assert pred.shape == label.shape and pred.ndim == 2
    B, N = pred.shape

    # Batch tile: as large as fits comfortably in VMEM (2 inputs x 2 pipeline
    # buffers x TB x N x 4B), rounded to the 8-row sublane tile.
    TB = min(block_rows, B)
    if B >= 8:
        TB = max(8, (TB // 8) * 8)
    G = pl.cdiv(B, TB)

    kernel = functools.partial(_relative_loss_partials_kernel, B=B, TB=TB, N=N)

    partials_raw = pl.pallas_call(
        kernel,
        grid=(G,),
        out_shape=jax.ShapeDtypeStruct((G * 8, 128), jnp.float32),
        in_specs=[
            pl.BlockSpec((TB, N), lambda i: (i, 0)),
            pl.BlockSpec((TB, N), lambda i: (i, 0)),
        ],
        out_specs=pl.BlockSpec((8, 128), lambda i: (i, 0)),
        compiler_params=pltpu.CompilerParams(
            dimension_semantics=("parallel",)),
    )(pred, label)

    # Tiny final combine in plain JAX (4 scalars per grid step).
    partials = partials_raw.reshape(G, 8, 128)[:, 0, :4]   # (G, 4)
    sums = jnp.sum(partials, axis=0)
    e_total, pos_sum, sharp_sum, smooth_sum = sums[0], sums[1], sums[2], sums[3]
    inv_b = 1.0 / B
    return (jnp.square(e_total) * integ_ratio
            + (pos_sum * inv_b) * pos_ratio
            + (sharp_sum * inv_b) * sharp_ratio
            + (smooth_sum * inv_b) * smooth_ratio)


def _reference(pred, label, integ_ratio=1.0, pos_ratio=1.0,
               sharp_ratio=1.0, smooth_ratio=1.0):
    def rel_err(p, l):
        cr = (jnp.max(l, axis=1) - jnp.min(l, axis=1)) ** 2
        return jnp.mean(jnp.sum((p - l) ** 2, axis=1) / cr)

    integ = jnp.square(jnp.sum(pred - label))
    pos = rel_err(pred, label)
    dp, dl = jnp.diff(pred, axis=1), jnp.diff(label, axis=1)
    sharp = rel_err(dp, dl)
    smooth = rel_err(jnp.diff(dp, axis=1), jnp.diff(dl, axis=1))
    return (integ * integ_ratio + pos * pos_ratio
            + sharp * sharp_ratio + smooth * smooth_ratio)


if __name__ == "__main__":
    key = jax.random.PRNGKey(0)
    k1, k2 = jax.random.split(key)
    B, N = 24, 128  # batch of 24 curves, 128 samples each
    pred = jax.random.normal(k1, (B, N), dtype=jnp.float32)
    label = jax.random.normal(k2, (B, N), dtype=jnp.float32)

    # block_rows=8 -> grid of 3 batch tiles, exercising the tiled/pipelined path.
    out = relative_loss(pred, label,
                        integ_ratio=1.0, pos_ratio=1.0,
                        sharp_ratio=1.0, smooth_ratio=1.0,
                        block_rows=8)
    out = jax.block_until_ready(out)

    ref = _reference(pred, label)
    # f32 summation order differs between the tiled kernel and the monolithic
    # reference (integral term is a squared global sum), so allow 2e-4.
    np.testing.assert_allclose(np.asarray(out), np.asarray(ref),
                               rtol=2e-4, atol=2e-4)
    print("KERNEL_OK")
</pallas_src>

<mosaic_0001>
module attributes {stable_mosaic.version = 11 : i64} {
  func.func @_relative_loss_partials_kernel(%arg0: i32, %arg1: memref<8x128xf32, #tpu.memory_space<vmem>>, %arg2: memref<8x128xf32, #tpu.memory_space<vmem>>, %arg3: memref<8x128xf32, #tpu.memory_space<vmem>>) attributes {dimension_semantics = [#tpu.dimension_semantics<parallel>], iteration_bounds = array<i64: 3>, scalar_prefetch = 0 : i64, scratch_operands = 0 : i64, tpu.core_type = #tpu.core_type<tc>, window_params = [{transform_indices = @transform_0, window_bounds = array<i64: 8, 128>}, {transform_indices = @transform_1, window_bounds = array<i64: 8, 128>}, {transform_indices = @transform_2, window_bounds = array<i64: 8, 128>}]} {
    %c0 = arith.constant 0 : index
    %c0_0 = arith.constant 0 : index
    %0 = vector.load %arg1[%c0, %c0_0] : memref<8x128xf32, #tpu.memory_space<vmem>>, vector<8x128xf32>
    %c0_1 = arith.constant 0 : index
    %c0_2 = arith.constant 0 : index
    %1 = vector.load %arg2[%c0_1, %c0_2] : memref<8x128xf32, #tpu.memory_space<vmem>>, vector<8x128xf32>
    %2 = arith.subf %0, %1 : vector<8x128xf32>
    %c8_i32 = arith.constant 8 : i32
    %3 = arith.muli %arg0, %c8_i32 : i32
    %4 = tpu.iota {dimensions = array<i32: 0>} : vector<8x1xi32>
    %5 = vector.broadcast %3 : i32 to vector<8x1xi32>
    %6 = arith.addi %5, %4 : vector<8x1xi32>
    %c24_i32 = arith.constant 24 : i32
    %7 = vector.broadcast %c24_i32 : i32 to vector<8x1xi32>
    %8 = arith.cmpi slt, %6, %7 : vector<8x1xi32>
    %9 = tpu.iota {dimensions = array<i32: 1>} : vector<8x128xi32>
    %c127_i32 = arith.constant 127 : i32
    %10 = vector.broadcast %c127_i32 : i32 to vector<8x128xi32>
    %11 = arith.cmpi slt, %9, %10 : vector<8x128xi32>
    %c126_i32 = arith.constant 126 : i32
    %12 = vector.broadcast %c126_i32 : i32 to vector<8x128xi32>
    %13 = arith.cmpi slt, %9, %12 : vector<8x128xi32>
    %c127_i32_3 = arith.constant 127 : i32
    %14 = tpu.dynamic_rotate %2 by %c127_i32_3 dim 1 : vector<8x128xf32>, i32 -> vector<8x128xf32>
    %15 = arith.subf %14, %2 : vector<8x128xf32>
    %c127_i32_4 = arith.constant 127 : i32
    %16 = tpu.dynamic_rotate %15 by %c127_i32_4 dim 1 : vector<8x128xf32>, i32 -> vector<8x128xf32>
    %17 = arith.subf %16, %15 : vector<8x128xf32>
    %c127_i32_5 = arith.constant 127 : i32
    %18 = tpu.dynamic_rotate %1 by %c127_i32_5 dim 1 : vector<8x128xf32>, i32 -> vector<8x128xf32>
    %19 = arith.subf %18, %1 : vector<8x128xf32>
    %c127_i32_6 = arith.constant 127 : i32
    %20 = tpu.dynamic_rotate %19 by %c127_i32_6 dim 1 : vector<8x128xf32>, i32 -> vector<8x128xf32>
    %21 = arith.subf %20, %19 : vector<8x128xf32>
    %cst = arith.constant 0.000000e+00 : f32
    %22 = vector.shape_cast %8 : vector<8x1xi1> to vector<8x1xi1>
    %23 = vector.broadcast %22 : vector<8x1xi1> to vector<8x128xi1>
    %24 = vector.broadcast %cst : f32 to vector<8x128xf32>
    %25 = arith.select %23, %2, %24 : vector<8x128xi1>, vector<8x128xf32>
    %26 = vector.shape_cast %25 : vector<8x128xf32> to vector<1x8x128xf32>
    %cst_7 = arith.constant dense<0.000000e+00> : vector<1xf32>
    %27 = vector.multi_reduction <add>, %26, %cst_7 [1, 2] : vector<1x8x128xf32> to vector<1xf32>
    %28 = vector.shape_cast %27 : vector<1xf32> to vector<1x1x1xf32>
    %29 = vector.extract %28[0, 0, 0] : f32 from vector<1x1x1xf32>
    %30 = arith.mulf %2, %2 : vector<8x128xf32>
    %cst_8 = arith.constant dense<0.000000e+00> : vector<8xf32>
    %31 = vector.multi_reduction <add>, %30, %cst_8 [1] : vector<8x128xf32> to vector<8xf32>
    %32 = vector.shape_cast %31 : vector<8xf32> to vector<8x1xf32>
    %cst_9 = arith.constant dense<0xFF800000> : vector<8xf32>
    %33 = vector.multi_reduction <maximumf>, %1, %cst_9 [1] : vector<8x128xf32> to vector<8xf32>
    %34 = vector.shape_cast %33 : vector<8xf32> to vector<8x1xf32>
    %cst_10 = arith.constant dense<0x7F800000> : vector<8xf32>
    %35 = vector.multi_reduction <minimumf>, %1, %cst_10 [1] : vector<8x128xf32> to vector<8xf32>
    %36 = vector.shape_cast %35 : vector<8xf32> to vector<8x1xf32>
    %37 = arith.subf %34, %36 : vector<8x1xf32>
    %38 = arith.mulf %37, %37 : vector<8x1xf32>
    %39 = arith.divf %32, %38 : vector<8x1xf32>
    %cst_11 = arith.constant 0.000000e+00 : f32
    %40 = vector.broadcast %cst_11 : f32 to vector<8x1xf32>
    %41 = arith.select %8, %39, %40 : vector<8x1xi1>, vector<8x1xf32>
    %42 = vector.shape_cast %41 : vector<8x1xf32> to vector<1x8x1xf32>
    %cst_12 = arith.constant dense<0.000000e+00> : vector<1xf32>
    %43 = vector.multi_reduction <add>, %42, %cst_12 [1, 2] : vector<1x8x1xf32> to vector<1xf32>
    %44 = vector.shape_cast %43 : vector<1xf32> to vector<1x1x1xf32>
    %45 = vector.extract %44[0, 0, 0] : f32 from vector<1x1x1xf32>
    %46 = arith.mulf %15, %15 : vector<8x128xf32>
    %cst_13 = arith.constant 0.000000e+00 : f32
    %47 = vector.broadcast %cst_13 : f32 to vector<8x128xf32>
    %48 = arith.select %11, %46, %47 : vector<8x128xi1>, vector<8x128xf32>
    %cst_14 = arith.constant dense<0.000000e+00> : vector<8xf32>
    %49 = vector.multi_reduction <add>, %48, %cst_14 [1] : vector<8x128xf32> to vector<8xf32>
    %50 = vector.shape_cast %49 : vector<8xf32> to vector<8x1xf32>
    %cst_15 = arith.constant 0xFF800000 : f32
    %51 = vector.broadcast %cst_15 : f32 to vector<8x128xf32>
    %52 = arith.select %11, %19, %51 : vector<8x128xi1>, vector<8x128xf32>
    %cst_16 = arith.constant dense<0xFF800000> : vector<8xf32>
    %53 = vector.multi_reduction <maximumf>, %52, %cst_16 [1] : vector<8x128xf32> to vector<8xf32>
    %54 = vector.shape_cast %53 : vector<8xf32> to vector<8x1xf32>
    %cst_17 = arith.constant 0x7F800000 : f32
    %55 = vector.broadcast %cst_17 : f32 to vector<8x128xf32>
    %56 = arith.select %11, %19, %55 : vector<8x128xi1>, vector<8x128xf32>
    %cst_18 = arith.constant dense<0x7F800000> : vector<8xf32>
    %57 = vector.multi_reduction <minimumf>, %56, %cst_18 [1] : vector<8x128xf32> to vector<8xf32>
    %58 = vector.shape_cast %57 : vector<8xf32> to vector<8x1xf32>
    %59 = arith.subf %54, %58 : vector<8x1xf32>
    %60 = arith.mulf %59, %59 : vector<8x1xf32>
    %61 = arith.divf %50, %60 : vector<8x1xf32>
    %cst_19 = arith.constant 0.000000e+00 : f32
    %62 = vector.broadcast %cst_19 : f32 to vector<8x1xf32>
    %63 = arith.select %8, %61, %62 : vector<8x1xi1>, vector<8x1xf32>
    %64 = vector.shape_cast %63 : vector<8x1xf32> to vector<1x8x1xf32>
    %cst_20 = arith.constant dense<0.000000e+00> : vector<1xf32>
    %65 = vector.multi_reduction <add>, %64, %cst_20 [1, 2] : vector<1x8x1xf32> to vector<1xf32>
    %66 = vector.shape_cast %65 : vector<1xf32> to vector<1x1x1xf32>
    %67 = vector.extract %66[0, 0, 0] : f32 from vector<1x1x1xf32>
    %68 = arith.mulf %17, %17 : vector<8x128xf32>
    %cst_21 = arith.constant 0.000000e+00 : f32
    %69 = vector.broadcast %cst_21 : f32 to vector<8x128xf32>
    %70 = arith.select %13, %68, %69 : vector<8x128xi1>, vector<8x128xf32>
    %cst_22 = arith.constant dense<0.000000e+00> : vector<8xf32>
    %71 = vector.multi_reduction <add>, %70, %cst_22 [1] : vector<8x128xf32> to vector<8xf32>
    %72 = vector.shape_cast %71 : vector<8xf32> to vector<8x1xf32>
    %cst_23 = arith.constant 0xFF800000 : f32
    %73 = vector.broadcast %cst_23 : f32 to vector<8x128xf32>
    %74 = arith.select %13, %21, %73 : vector<8x128xi1>, vector<8x128xf32>
    %cst_24 = arith.constant dense<0xFF800000> : vector<8xf32>
    %75 = vector.multi_reduction <maximumf>, %74, %cst_24 [1] : vector<8x128xf32> to vector<8xf32>
    %76 = vector.shape_cast %75 : vector<8xf32> to vector<8x1xf32>
    %cst_25 = arith.constant 0x7F800000 : f32
    %77 = vector.broadcast %cst_25 : f32 to vector<8x128xf32>
    %78 = arith.select %13, %21, %77 : vector<8x128xi1>, vector<8x128xf32>
    %cst_26 = arith.constant dense<0x7F800000> : vector<8xf32>
    %79 = vector.multi_reduction <minimumf>, %78, %cst_26 [1] : vector<8x128xf32> to vector<8xf32>
    %80 = vector.shape_cast %79 : vector<8xf32> to vector<8x1xf32>
    %81 = arith.subf %76, %80 : vector<8x1xf32>
    %82 = arith.mulf %81, %81 : vector<8x1xf32>
    %83 = arith.divf %72, %82 : vector<8x1xf32>
    %cst_27 = arith.constant 0.000000e+00 : f32
    %84 = vector.broadcast %cst_27 : f32 to vector<8x1xf32>
    %85 = arith.select %8, %83, %84 : vector<8x1xi1>, vector<8x1xf32>
    %86 = vector.shape_cast %85 : vector<8x1xf32> to vector<1x8x1xf32>
    %cst_28 = arith.constant dense<0.000000e+00> : vector<1xf32>
    %87 = vector.multi_reduction <add>, %86, %cst_28 [1, 2] : vector<1x8x1xf32> to vector<1xf32>
    %88 = vector.shape_cast %87 : vector<1xf32> to vector<1x1x1xf32>
    %89 = vector.extract %88[0, 0, 0] : f32 from vector<1x1x1xf32>
    %90 = tpu.iota {dimensions = array<i32: 1>} : vector<8x128xi32>
    %c0_i32 = arith.constant 0 : i32
    %91 = vector.broadcast %c0_i32 : i32 to vector<8x128xi32>
    %92 = arith.cmpi eq, %90, %91 : vector<8x128xi32>
    %cst_29 = arith.constant 0.000000e+00 : f32
    %93 = vector.broadcast %29 : f32 to vector<8x128xf32>
    %94 = vector.broadcast %cst_29 : f32 to vector<8x128xf32>
    %95 = arith.select %92, %93, %94 : vector<8x128xi1>, vector<8x128xf32>
    %c1_i32 = arith.constant 1 : i32
    %96 = vector.broadcast %c1_i32 : i32 to vector<8x128xi32>
    %97 = arith.cmpi eq, %90, %96 : vector<8x128xi32>
    %cst_30 = arith.constant 0.000000e+00 : f32
    %98 = vector.broadcast %45 : f32 to vector<8x128xf32>
    %99 = vector.broadcast %cst_30 : f32 to vector<8x128xf32>
    %100 = arith.select %97, %98, %99 : vector<8x128xi1>, vector<8x128xf32>
    %101 = arith.addf %95, %100 : vector<8x128xf32>
    %c2_i32 = arith.constant 2 : i32
    %102 = vector.broadcast %c2_i32 : i32 to vector<8x128xi32>
    %103 = arith.cmpi eq, %90, %102 : vector<8x128xi32>
    %cst_31 = arith.constant 0.000000e+00 : f32
    %104 = vector.broadcast %67 : f32 to vector<8x128xf32>
    %105 = vector.broadcast %cst_31 : f32 to vector<8x128xf32>
    %106 = arith.select %103, %104, %105 : vector<8x128xi1>, vector<8x128xf32>
    %107 = arith.addf %101, %106 : vector<8x128xf32>
    %c3_i32 = arith.constant 3 : i32
    %108 = vector.broadcast %c3_i32 : i32 to vector<8x128xi32>
    %109 = arith.cmpi eq, %90, %108 : vector<8x128xi32>
    %cst_32 = arith.constant 0.000000e+00 : f32
    %110 = vector.broadcast %89 : f32 to vector<8x128xf32>
    %111 = vector.broadcast %cst_32 : f32 to vector<8x128xf32>
    %112 = arith.select %109, %110, %111 : vector<8x128xi1>, vector<8x128xf32>
    %113 = arith.addf %107, %112 : vector<8x128xf32>
    %c0_33 = arith.constant 0 : index
    %c0_34 = arith.constant 0 : index
    %114 = vector.load %arg3[%c0_33, %c0_34] : memref<8x128xf32, #tpu.memory_space<vmem>>, vector<8x128xf32>
    tpu.vector_store %arg3[%c0_33, %c0_34], %113 {strides = array<i32>} : memref<8x128xf32, #tpu.memory_space<vmem>>, vector<8x128xf32>,
    return
  }
  func.func @transform_0(%arg0: i32) -> (i32, i32) {
    %c0_i32 = arith.constant 0 : i32
    %c0_i32_0 = arith.constant 0 : i32
    return %arg0, %c0_i32 : i32, i32
  }
  func.func @transform_1(%arg0: i32) -> (i32, i32) {
    %c0_i32 = arith.constant 0 : i32
    %c0_i32_0 = arith.constant 0 : i32
    return %arg0, %c0_i32 : i32, i32
  }
  func.func @transform_2(%arg0: i32) -> (i32, i32) {
    %c0_i32 = arith.constant 0 : i32
    %c0_i32_0 = arith.constant 0 : i32
    return %arg0, %c0_i32 : i32, i32
  }
}

</mosaic_0001>

<bundles_post_ra>
// kernel: tpu_custom_call.1
= control target key start
LH: loop header
LB: loop body
LE: loop exit
PB: predicated region body
PF: predicated region fallthrough
CT: control target
= control target key end

     0   :  { %7 = vsyncpa [#allocation3], 0  ;;  %s872_s0 = inlined_call_operand.hbm [shape: f32[24,128], index: 0, kind: input, shape index: {}]   ;;  %s873_s1 = inlined_call_operand.hbm [shape: f32[24,128], index: 1, kind: input, shape index: {}]   ;;  %s874_s2 = inlined_call_operand.hbm [shape: f32[24,128], index: 2, kind: output, shape index: {}]  }
   0x1   :  { %9 = vsyncpa [#allocation3 + $0x1], 0 }
   0x2   :  { %10 = vsyncpa [#allocation6], 0 }
   0x3   :  { %12 = vsyncpa [#allocation6 + $0x1], 0 }
   0x4   :  { %13 = vsyncpa [#allocation4], 0 }
   0x5   :  { %15 = vsyncpa [#allocation4 + $0x1], 0  ;;  %s656_s9 = smov 0   ;;  %s658_s10 = smov 0  }
   0x6   :  { %s660_s11 = smov 0   ;;  %s662_s12 = smov 0  }
   0x7 LB: > { %s677_s13 = sadd.s32 4294967295, %s635_s12   ;;  %s429_s14 = sadd.s32 4294967294, %s635_s12   ;;  %s635_s12 = sphi %s662_s12, %s892_s12   ;;  %s631_s11 = sphi %s660_s11, %s891_s11   ;;  %s627_s10 = sphi %s658_s10, %s890_s10   ;;  %s623_s9 = sphi %s656_s9, %s889_s9  }
   0x8   : > { %s681_s15 = sadd.s32 1, %s635_s12   ;;  %s28_s16 = sadd.s32 1, %s631_s11 }
   0x9   : > { %s25_s17 = ssub.s32 %s635_s12, %s681_s15  ;;  %p35_p0 = scmp.ne.s32.totalorder %s631_s11, %s627_s10 }
   0xa   : > { %p26_p1 = scmp.eq.s32.totalorder %s25_s17, 0  ;;  %p36_p2 = scmp.eq.s32.totalorder %s635_s12, 0 }
   0xb   : > { %p41_p3 = scmp.ne.s32.totalorder %s627_s10, %s623_s9  ;;  %p42_p4 = scmp.eq.s32.totalorder %s677_s13, 0 }
   0xc   : > { %s693_s18 = scalar_select %p26_p1, %s631_s11, %s28_s16  }
   0xd   : > { %p695_p5 = por %p36_p2, %p35_p0  ;;  %p699_p6 = por %p42_p4, %p41_p3 }
   0xe   : > { %p91_p7 = scmp.eq.s32.totalorder %s677_s13, 2  ;;  %p97_p8 = scmp.eq.s32.totalorder %s429_s14, 2 }
   0xf   : > { %s878_s20 = scalar_select %p699_p6, 1, 0 }
  0x10   : > { %p470_p9 = scmp.lt.s32.totalorder %s635_s12, 3  ;;  %p705_p10 = por %p91_p7, %p35_p0 }
  0x11   : > { %p709_p11 = por %p97_p8, %p41_p3  ;;  %s714_s23 = sand.u32 1, %s631_s11  }
  0x12   : > { %s879_s21 = scalar_select %p705_p10, 1, 0 }
  0x13   : > { %s880_s22 = scalar_select %p709_p11, 1, 0 }
  0x14   : > { %s433_s24 = sshll.u32 %s635_s12, 7  ;;  %s432_s25 = sshll.u32 %s714_s23, 3 }
  0x15   : > { %s723_s28 = scalar_lea.hbm %s872_s0, %s433_s24  ;;  %s121_s29 = scalar_lea.vmem [#allocation2], %s432_s25 }
  0x16   : > { %s128_s30 = sshll.u32 %s121_s29, 4  ;;  %p729_p12 = pnand %p470_p9, %p695_p5  ;;  %s733_s30 = int_to_ptr.vmem [resolvable:$true] %s128_s30 }
  0x17   : > { %s118_s4 = scalar_lea.sflag [#allocation3], %s714_s23  ;;  %s511_s5 = scalar_lea.hbm %s723_s28, 128 }
  0x18   : > { %p512_p1 = scmp.ne.s32.totalorder %s723_s28, %s511_s5  ;;  %p513_p2 = pneg %p729_p12 }
  0x19   : > { %s516_s8 = scalar_lea.hbm %s872_s0, 384  ;;  %p517_p5 = scmp.lt.s32.totalorder %s723_s28, %s872_s0 }
  0x1a   : > { %p514_p3 = pnand %p513_p2, %p512_p1  ;;  %p518_p7 = scmp.lt.s32.totalorder %s516_s8, %s511_s5 }
  0x1c   : > { %p515_p4 = pneg %p514_p3  ;;  %p519_p8 = por %p518_p7, %p517_p5 }
  0x1e   : > { %p520_p9 = pnand %p519_p8, %p515_p4 }
  0x20   : > { %523 = shalt.err (!%p520_p9)
}
  0x21   : > { %s524_s17 = scalar_lea.vmem %s733_s30, 128  ;;  %s637_s19 = smov [#allocation2]  }
  0x22   : > { %p525_p13 = scmp.ne.s32.totalorder %s733_s30, %s524_s17  ;;  %s529_s26 = sshll.u32 %s637_s19, 4  ;;  %s530_s26 = int_to_ptr.vmem [resolvable:$false] %s529_s26 }
  0x23   : > { %s531_s27 = scalar_lea.vmem %s530_s26, 256  ;;  %p532_p0 = scmp.lt.s32.totalorder %s733_s30, %s530_s26 }
  0x24   : > { %p527_p1 = pnand %p525_p13, %p513_p2  ;;  %p533_p11 = scmp.lt.s32.totalorder %s531_s27, %s524_s17 }
  0x26   : > { %p528_p3 = pneg %p527_p1  ;;  %p534_p10 = por %p533_p11, %p532_p0 }
  0x28   : > { %p535_p5 = pnand %p534_p10, %p528_p3 }
  0x2a   : > { %538 = shalt.err (!%p535_p5)
}
  0x2b   : > { %462 = dma.hbm_to_vmem [thread:$0]  (!%p729_p12), %s723_s28, 128, %s733_s30, %s118_s4  }
  0x2c   : > { %p882_p13 = scmp.lt.s32.totalorder %s635_s12, 4  ;;  %p883_p4 = scmp.ge.s32.totalorder %s635_s12, 1 }
  0x2d   : > { %s775_s7 = scalar_lea.hbm %s873_s1, %s433_s24  ;;  %s139_s8 = scalar_lea.vmem [#allocation5], %s432_s25 }
  0x2e   : > { %p766_p7 = pnand %p883_p4, %p882_p13  ;;  %s146_s14 = sshll.u32 %s139_s8, 4  ;;  %s147_s14 = int_to_ptr.vmem [resolvable:$true] %s146_s14 }
  0x2f   : > { %s136_s28 = scalar_lea.sflag [#allocation6], %s714_s23  ;;  %s539_s30 = scalar_lea.hbm %s775_s7, 128 }
  0x30   : > { %s884_s29 = scalar_select %p766_p7, 1, 0 }
  0x31   : > { %p540_p10 = scmp.ne.s32.totalorder %s775_s7, %s539_s30  ;;  %s544_s17 = scalar_lea.hbm %s873_s1, 384 }
  0x32   : > { %p545_p8 = scmp.lt.s32.totalorder %s775_s7, %s873_s1  ;;  %p546_p9 = scmp.lt.s32.totalorder %s544_s17, %s539_s30 }
  0x33   : > { %p542_p11 = pnand %p540_p10, %p513_p2 }
  0x34   : > { %p547_p1 = por %p546_p9, %p545_p8 }
  0x35   : > { %p543_p0 = pneg %p542_p11 }
  0x37   : > { %p548_p3 = pnand %p547_p1, %p543_p0 }
  0x39   : > { %551 = shalt.err (!%p548_p3)
}
  0x3a   : > { %s552_s25 = scalar_lea.vmem %s147_s14, 128  ;;  %s638_s23 = smov [#allocation5]  }
  0x3b   : > { %p553_p5 = scmp.ne.s32.totalorder %s147_s14, %s552_s25  ;;  %s557_s26 = sshll.u32 %s638_s23, 4  ;;  %s558_s26 = int_to_ptr.vmem [resolvable:$false] %s557_s26 }
  0x3c   : > { %s559_s27 = scalar_lea.vmem %s558_s26, 256  ;;  %p560_p10 = scmp.lt.s32.totalorder %s147_s14, %s558_s26 }
  0x3d   : > { %p555_p13 = pnand %p553_p5, %p513_p2  ;;  %p561_p11 = scmp.lt.s32.totalorder %s559_s27, %s552_s25 }
  0x3f   : > { %p556_p4 = pneg %p555_p13  ;;  %p562_p6 = por %p561_p11, %p560_p10 }
  0x41   : > { %p563_p7 = pnand %p562_p6, %p556_p4 }
  0x43   : > { %566 = shalt.err (!%p563_p7)
}
  0x44   : > { %465 = dma.hbm_to_vmem [thread:$0]  (!%p729_p12), %s775_s7, 128, %s147_s14, %s136_s28  }
  0x45   : > { %p885_p0 = scmp.ne.s32.totalorder %s884_s29, 0 }
  0x46   : > { %s801_s5 = sand.u32 (!%p885_p0), 1, %s627_s10   ;;  %p886_p6 = scmp.ne.s32.totalorder (!%p885_p0), %s878_s20, 0 }
  0x47   : > { %155 = sbr.rel (%p885_p0) target bundleno = 692 (0x2b4), region = 28  ;;  %s804_s6 = sshll.u32 (!%p885_p0), %s801_s5, 3 }
  0x48   : > { %s158_s8 = scalar_lea.sflag (!%p885_p0), [#allocation3], %s801_s5  ;;  %s161_s30 = scalar_lea.vmem (!%p885_p0), [#allocation2], %s804_s6 }
  0x4c   : > { %610 = dma.done.wait (%p886_p6), %s158_s8, 128  }
  0x4d   : > { %612 = vsyncadd (%p886_p6), %s158_s8, 4294967168  ;;  %s167_s3 = scalar_lea.sflag [#allocation6], %s801_s5  ;;  %s170_s29 = scalar_lea.vmem [#allocation5], %s804_s6 }
  0x4e   : > { %614 = dma.done.wait (%p886_p6), %s167_s3, 128  }
  0x4f   : > { %616 = vsyncadd (%p886_p6), %s167_s3, 4294967168  ;;  %v197_v0 = vld [vmem:[%s170_s29] sm:$0xff]  ;;  %v196_v1 = vld [vmem:[%s161_s30] sm:$0xff]  ;;  %s639_s7 = smov 127   ;;  %v200_v3 = vlaneseq  ;;  %s440_s20 = sshll.u32 %s677_s13, 3  ;;  %vm245_vm3 = vcmask 7168  }
  0x50   : > { %215 = vrot.lane.b32.xlu0 %v197_v0, %s639_s7  ;;  %v198_v2 = vsub.f32 %v196_v1, %v197_v0  ;;  %v202_v23 = vstv %s440_s20  ;;  %s442_s16 = sshll.u32 %s677_s13, 7  ;;  %s195_s24 = scalar_lea.vmem [#allocation7], %s804_s6 }
  0x51   : > { %v818_v4 = vand.u32 127, %v200_v3  ;;  %v201_v22 = vshrl.u32 %v200_v3, 7  ;;  %s336_s19 = sshll.u32 %s195_s24, 4  ;;  %s334_s26 = scalar_lea.hbm %s874_s2, %s442_s16  ;;  %s337_s19 = int_to_ptr.vmem [resolvable:$true] %s336_s19 }
  0x52   : > { %v233_v17 = vmul.f32 %v198_v2, %v198_v2  ;;  %s323_s27 = scalar_lea.sflag [#allocation4], %s801_s5  ;;  %s567_s8 = scalar_lea.vmem %s337_s19, 128 }
  0x53   : > { %vm207_vm0 = vcmp.lt.s32.totalorder %v818_v4, 127  ;;  %vm208_vm1 = vcmp.lt.s32.totalorder %v818_v4, 126  ;;  %v203_v24 = vadd.s32 %v202_v23, %v201_v22  ;;  %vm306_vm4 = vcmp.eq.s32.totalorder %v818_v4, 0  ;;  %p568_p12 = scmp.ne.s32.totalorder %s337_s19, %s567_s8  ;;  %p887_p2 = scmp.ne.s32.totalorder %s879_s21, 0 }
  0x54   : > { %209 = vrot.lane.b32.xlu0 %v198_v2, %s639_s7  ;;  %vm309_vm5 = vcmp.eq.s32.totalorder %v818_v4, 1  ;;  %vm313_vm6 = vcmp.eq.s32.totalorder %v818_v4, 2  ;;  %vm317_vm7 = vcmp.eq.s32.totalorder %v818_v4, 3  ;;  %s640_s13 = smov [#allocation7]  }
  0x55   : > { %vm204_vm2 = vcmp.lt.s32.totalorder %v203_v24, 24  ;;  %p569_p7 = pnand %p568_p12, %p887_p2  ;;  %s571_s30 = sshll.u32 %s640_s13, 4  ;;  %s572_s30 = int_to_ptr.vmem [resolvable:$false] %s571_s30 }
  0x56   : > { %v223_v25 = vsel %vm204_vm2, %v198_v2, 0.0  ;;  %s573_s6 = scalar_lea.vmem %s572_s30, 256  ;;  %p574_p9 = scmp.lt.s32.totalorder %s337_s19, %s572_s30 }
  0x57   : > { %p570_p8 = pneg %p569_p7  ;;  %p575_p1 = scmp.lt.s32.totalorder %s573_s6, %s567_s8 }
  0x59   : > { %p576_p3 = por %p575_p1, %p574_p9 }
  0x5b   : > { %p577_p5 = pnand %p576_p3, %p570_p8 }
  0x73   : > { %236 = vmax.xlane.f32.xlu0 %v197_v0 }
  0xc2   : > { %v216_v5 = vpop.permute.xlu0 %215 }
  0xc3   : > { %v217_v6 = vsub.f32 %v216_v5, %v197_v0 }
  0xc5   : > { %218 = vrot.lane.b32.xlu1 %v217_v6, %s639_s7  ;;  %v260_v7 = vsel %vm207_vm0, %v217_v6, -inf  ;;  %v263_v10 = vsel %vm207_vm0, %v217_v6, inf }
  0xc6   : > { %261 = vmax.xlane.f32.xlu0 %v260_v7  ;;  %v210_v8 = vpop.permute.xlu0 %209 }
  0xc7   : > { %v211_v9 = vsub.f32 %v210_v8, %v198_v2 }
  0xc9   : > { %212 = vrot.lane.b32.xlu1 %v211_v9, %s639_s7  ;;  %v256_v15 = vmul.f32 %v211_v9, %v211_v9 }
  0xca   : > { %264 = vmin.xlane.f32.xlu0 %v263_v10 }
  0xcb   : > { %v257_v20 = vsel %vm207_vm0, %v256_v15, 0.0 }
  0xed   : > { %238 = vmin.xlane.f32.xlu1 %v197_v0 }
  0xfc   : > { %v237_v26 = vpop.xlane.xlu0 %236 }
 0x137   : > { %v219_v11 = vpop.permute.xlu1 %218 }
 0x138   : > { %v220_v12 = vsub.f32 %v219_v11, %v217_v6 }
 0x13a   : > { %v288_v13 = vsel %vm208_vm1, %v220_v12, inf  ;;  %v285_v14 = vsel %vm208_vm1, %v220_v12, -inf }
 0x13b   : > { %289 = vmin.xlane.f32.xlu0 %v288_v13  ;;  %286 = vmax.xlane.f32.xlu1 %v285_v14  ;;  %v213_v16 = vpop.permute.xlu1 %212 }
 0x13c   : > { %v214_v18 = vsub.f32 %v213_v16, %v211_v9 }
 0x13e   : > { %v281_v19 = vmul.f32 %v214_v18, %v214_v18 }
 0x13f   : > { %258 = vadd.xlane.f32.xlu0 %v257_v20  ;;  %234 = vadd.xlane.f32.xlu1 %v233_v17 }
 0x140   : > { %v282_v21 = vsel %vm208_vm1, %v281_v19, 0.0 }
 0x143   : > { %283 = vadd.xlane.f32.xlu1 %v282_v21  ;;  %224 = vadd.xlane.f32.xlu0 %v223_v25 }
 0x14f   : > { %v262_v27 = vpop.xlane.xlu0 %261 }
 0x153   : > { %v265_v29 = vpop.xlane.xlu0 %264 }
 0x154   : > { %v266_v31 = vsub.f32 %v262_v27, %v265_v29 }
 0x156   : > { %v267_v33 = vmul.f32 %v266_v31, %v266_v31 }
 0x176   : > { %v239_v28 = vpop.xlane.xlu1 %238 }
 0x177   : > { %v240_v30 = vsub.f32 %v237_v26, %v239_v28 }
 0x179   : > { %v241_v32 = vmul.f32 %v240_v30, %v240_v30 }
 0x17b   : > { %505 = vrcp.f32 %v241_v32 }
 0x17c   : > { %507 = vrcp.f32 %v267_v33 }
 0x188   : > { %v506_v37 = vpop.eup %505 }
 0x189   : > { %v508_v39 = vpop.eup %507 }
 0x1c4   : > { %v287_v34 = vpop.xlane.xlu1 %286  ;;  %v290_v35 = vpop.xlane.xlu0 %289 }
 0x1c5   : > { %v291_v36 = vsub.f32 %v287_v34, %v290_v35 }
 0x1c7   : > { %v292_v38 = vmul.f32 %v291_v36, %v291_v36 }
 0x1c8   : > { %v259_v40 = vpop.xlane.xlu0 %258  ;;  %v235_v41 = vpop.xlane.xlu1 %234 }
 0x1c9   : > { %509 = vrcp.f32 %v292_v38  ;;  %v269_v42 = vmul.f32 %v508_v39, %v259_v40  ;;  %v243_v43 = vmul.f32 %v506_v37, %v235_v41 }
 0x1cb   : > { %v244_v44 = vsel %vm204_vm2, %v243_v43, 0.0  ;;  %v270_v45 = vsel %vm204_vm2, %v269_v42, 0.0 }
 0x1cc   : > { %v246_v46 = vsel %vm245_vm3, %v244_v44, 0.0  ;;  %v271_v47 = vsel %vm245_vm3, %v270_v45, 0.0  ;;  %v225_v48 = vpop.xlane.xlu0 %224  ;;  %v284_v52 = vpop.xlane.xlu1 %283 }
 0x1cd   : > { %247 = vadd.xlane.f32.xlu1 %v246_v46  ;;  %272 = vadd.xlane.f32.xlu0 %v271_v47  ;;  %v226_v49 = vrot.slane %v225_v48, 4 }
 0x1cf   : > { %v227_v50 = vadd.f32 %v226_v49, %v225_v48 }
 0x1d1   : > { %v228_v55 = vrot.slane %v227_v50, 2 }
 0x1d3   : > { %v229_v57 = vadd.f32 %v228_v55, %v227_v50 }
 0x1d5   : > { %v230_v58 = vrot.slane %v229_v57, 1 }
 0x1d6   : > { %v510_v51 = vpop.eup %509 }
 0x1d7   : > { %v294_v53 = vmul.f32 %v510_v51, %v284_v52  ;;  %v231_v59 = vadd.f32 %v230_v58, %v229_v57 }
 0x1d9   : > { %v295_v54 = vsel %vm204_vm2, %v294_v53, 0.0  ;;  %445 = vpush %v231_v59 }
 0x1da   : > { %v296_v56 = vsel %vm245_vm3, %v295_v54, 0.0 }
 0x1db   : > { %297 = vadd.xlane.f32.xlu1 %v296_v56 }
 0x20a   : > { %s446_s14 = spop %445 }
 0x20b   : > { %v307_v18 = vstv %s446_s14 }
 0x20c   : > { %v308_v20 = vsel %vm306_vm4, %v307_v18, 0.0 }
 0x256   : > { %v248_v60 = vpop.xlane.xlu1 %247  ;;  %v273_v61 = vpop.xlane.xlu0 %272 }
 0x257   : > { %v249_v62 = vrot.slane %v248_v60, 4  ;;  %v274_v63 = vrot.slane %v273_v61, 4 }
 0x259   : > { %v250_v0 = vadd.f32 %v249_v62, %v248_v60  ;;  %v275_v1 = vadd.f32 %v274_v63, %v273_v61 }
 0x25b   : > { %v251_v2 = vrot.slane %v250_v0, 2  ;;  %v276_v3 = vrot.slane %v275_v1, 2 }
 0x25d   : > { %v277_v5 = vadd.f32 %v276_v3, %v275_v1  ;;  %v252_v6 = vadd.f32 %v251_v2, %v250_v0 }
 0x25f   : > { %v253_v7 = vrot.slane %v252_v6, 1  ;;  %v278_v8 = vrot.slane %v277_v5, 1 }
 0x261   : > { %v254_v9 = vadd.f32 %v253_v7, %v252_v6  ;;  %v279_v10 = vadd.f32 %v278_v8, %v277_v5 }
 0x263   : > { %447 = vpush %v254_v9 }
 0x264   : > { %449 = vpush %v279_v10  ;;  %v298_v11 = vpop.xlane.xlu1 %297 }
 0x265   : > { %v299_v12 = vrot.slane %v298_v11, 4 }
 0x267   : > { %v300_v13 = vadd.f32 %v299_v12, %v298_v11 }
 0x269   : > { %v301_v14 = vrot.slane %v300_v13, 2 }
 0x26b   : > { %v302_v15 = vadd.f32 %v301_v14, %v300_v13 }
 0x26d   : > { %v303_v16 = vrot.slane %v302_v15, 1 }
 0x26f   : > { %v304_v17 = vadd.f32 %v303_v16, %v302_v15 }
 0x271   : > { %451 = vpush %v304_v17 }
 0x294   : > { %s448_s28 = spop %447 }
 0x295   : > { %v310_v19 = vstv %s448_s28  ;;  %s450_s4 = spop %449 }
 0x296   : > { %v311_v21 = vsel %vm309_vm5, %v310_v19, 0.0  ;;  %v314_v23 = vstv %s450_s4 }
 0x297   : > { %v312_v22 = vadd.f32 %v311_v21, %v308_v20  ;;  %v315_v24 = vsel %vm313_vm6, %v314_v23, 0.0 }
 0x299   : > { %v316_v25 = vadd.f32 %v315_v24, %v312_v22 }
 0x2a2   : > { %s452_s17 = spop %451 }
 0x2a3   : > { %v318_v26 = vstv %s452_s17 }
 0x2a4   : > { %v319_v27 = vsel %vm317_vm7, %v318_v26, 0.0 }
 0x2a5   : > { %v320_v28 = vadd.f32 %v319_v27, %v316_v25 }
 0x2a7   : > { %321 = vst [vmem:[%s195_s24] sm:$0xff] %v320_v28 }
 0x2a8   : > { %580 = shalt.err (!%p577_p5)
}
 0x2a9   : > { %s581_s3 = scalar_lea.hbm %s334_s26, 128  ;;  %s585_s7 = scalar_lea.hbm %s874_s2, 384 }
 0x2aa   : > { %p582_p13 = scmp.ne.s32.totalorder %s334_s26, %s581_s3  ;;  %p586_p11 = scmp.lt.s32.totalorder %s334_s26, %s874_s2 }
 0x2ab   : > { %p587_p0 = scmp.lt.s32.totalorder %s585_s7, %s581_s3 }
 0x2ac   : > { %p583_p4 = pnand %p582_p13, %p887_p2 }
 0x2ad   : > { %p588_p6 = por %p587_p0, %p586_p11 }
 0x2ae   : > { %p584_p10 = pneg %p583_p4 }
 0x2b0   : > { %p589_p12 = pnand %p588_p6, %p584_p10 }
 0x2b2   : > { %592 = shalt.err (!%p589_p12)
}
 0x2b3   : > { %457 = dma.vmem_to_hbm [thread:$0]  (%p887_p2), %s337_s19, 128, %s334_s26, %s323_s27  }
 0x2b4 PF: > { %p471_p7 = scmp.ge.s32.totalorder %s635_s12, 2  ;;  %s348_s28 = sand.u32 1, %s623_s9  }
 0x2b5   : > { %p888_p8 = scmp.ne.s32.totalorder %s880_s22, 0  ;;  %s349_s4 = scalar_lea.sflag [#allocation4], %s348_s28 }
 0x2b7   : > { %p467_p9 = pnand %p471_p7, %p888_p8 }
 0x2b9   : > { %p468_p1 = pneg %p467_p9 }
 0x2bb   : > { %618 = dma.done.wait (%p468_p1), %s349_s4, 128  }
 0x2bc   : > { %620 = vsyncadd (%p468_p1), %s349_s4, 4294967168  ;;  %p18_p3 = scmp.ge.s32.totalorder %s681_s15, 5   ;;  %s889_s9 = smov %s627_s10 }
 0x2bd   : > { %s890_s10 = smov %s631_s11  ;;  %s891_s11 = smov %s693_s18 }
 0x2be   : > { %s892_s12 = smov %s681_s15  ;;  %20 = sbr.rel (!%p18_p3) target bundleno = 7 (0x7), region = 86 }
 0x2c3   :  { %354 = vsyncpa [#allocation3], 1 }
 0x2c4   :  { %356 = vsyncpa [#allocation3 + $0x1], 1 }
 0x2c5   :  { %357 = vsyncpa [#allocation6], 1 }
 0x2c6   :  { %359 = vsyncpa [#allocation6 + $0x1], 1 }
 0x2c7   :  { %360 = vsyncpa [#allocation4], 1 }
 0x2c8   :  { %362 = vsyncpa [#allocation4 + $0x1], 1 }

</bundles_post_ra>
